<compile_context>
chip_gen: v5e
topology: v5e:2x2
jax: 0.10.0
libtpu: 0.0.40
codegen_flags: <defaults>
</compile_context>

<pallas_src>
import jax
import jax.numpy as jnp
from jax.experimental import pallas as pl
from jax.experimental.pallas import tpu as pltpu


def _round_up(x, m):
    return ((x + m - 1) // m) * m


def _vmem_limit_bytes(default_bytes=48 * 1024 * 1024):
    """Generation-aware VMEM limit: ~75% of physical capacity (v5e/v6e: 128 MiB
    -> 96 MiB, v7x: 64 MiB -> 48 MiB), leaving headroom for compiler-internal
    scratch.  Falls back to a conservative 48 MiB if the query is unavailable."""
    try:
        info = pltpu.get_tpu_info()
        cap = getattr(info, "vmem_capacity_bytes", None)
        if cap:
            return int(cap * 3 // 4)
    except Exception:
        pass
    return default_bytes


# ----------------------------------------------------------------------------
# Kernel: one grid step == one GCNConv + ReLU.
#
#   j = 0 .. 2*num_layers-1   (even j: node conv with A_node, odd j: community
#                              conv with A_comm -- selected by the A-stack
#                              index_map, j % 2)
#   h   = X @ W_j              (bf16 x bf16 -> f32 acc, MXU)
#   agg = A_j @ h              (bf16 x bf16 -> f32 acc, MXU)
#   X   = relu(agg + b_j)      (f32 epilogue, VPU)
#
# Activations live in the persistent bf16 VMEM scratch `x_scr` between steps;
# only the final activation's first out_pad columns are stored to o_ref.
# ----------------------------------------------------------------------------
def _cfn_conv_kernel(a_ref, x_ref, w_ref, b_ref, o_ref, x_scr):
    j = pl.program_id(0)
    last = pl.num_programs(0) - 1

    # Load the input features into the persistent scratch on the first conv
    # only (one (Np, Fp) vld+vst pass, step 0 only).
    @pl.when(j == 0)
    def _():
        x_scr[...] = x_ref[...]

    x_in = x_scr[...]                                               # (Np, Fp) bf16
    h = jnp.dot(x_in, w_ref[0], preferred_element_type=jnp.float32)
    agg = jnp.dot(a_ref[0], h.astype(jnp.bfloat16),
                  preferred_element_type=jnp.float32)
    y = jnp.maximum(agg + b_ref[0], 0.0)                            # (Np, Fp) f32

    @pl.when(j < last)
    def _():
        x_scr[...] = y.astype(x_scr.dtype)

    @pl.when(j == last)
    def _():
        out_cols = o_ref.shape[1]                                   # static
        o_ref[...] = y[:, :out_cols].astype(o_ref.dtype)


# ----------------------------------------------------------------------------
# Glue: GCN adjacency normalization and parameter construction.
# ----------------------------------------------------------------------------
def build_norm_adj(edge_index, num_nodes):
    """Dense A_norm = D^{-1/2} (A + I_missing) D^{-1/2}; A[dst, src] += 1 per
    edge (multigraph edges sum, as PyG sums one message per edge); self-loops
    are added only for nodes that do not already have one."""
    src = edge_index[0]
    dst = edge_index[1]
    a = jnp.zeros((num_nodes, num_nodes), jnp.float32).at[dst, src].add(1.0)
    diag = jnp.diag(a)
    a = a + jnp.diag(jnp.where(diag > 0.0, 0.0, 1.0))
    deg = a.sum(axis=1)
    d_inv_sqrt = jnp.where(deg > 0, 1.0 / jnp.sqrt(deg), 0.0)
    return d_inv_sqrt[:, None] * a * d_inv_sqrt[None, :]


def glorot(key, fan_in, fan_out):
    limit = jnp.sqrt(6.0 / (fan_in + fan_out))
    return jax.random.uniform(
        key, (fan_in, fan_out), jnp.float32, minval=-limit, maxval=limit
    )


def init_cfn_params(key, input_dim, hidden_dim, output_dim, num_layers):
    """Mirrors CommunityFocusedNetwork.__init__: per layer a node conv and a
    community conv (each GCNConv: glorot weight + zero bias)."""
    params = []
    for i in range(num_layers):
        node_in = input_dim if i == 0 else hidden_dim
        comm_out = hidden_dim if i < num_layers - 1 else output_dim
        key, k1, k2 = jax.random.split(key, 3)
        node_w = glorot(k1, node_in, hidden_dim)
        node_b = jnp.zeros((1, hidden_dim), jnp.float32)
        comm_w = glorot(k2, hidden_dim, comm_out)
        comm_b = jnp.zeros((1, comm_out), jnp.float32)
        params.append((node_w, node_b, comm_w, comm_b))
    return params


def community_focused_network_forward(params, x, edge_index, community_edge_index):
    """Forward pass matching the PyTorch module, fused into one pallas_call:
       for each layer:
         x = ReLU(node_conv(x, edge_index))
         x = ReLU(community_conv(x, community_edge_index))
    """
    n, fin = x.shape
    hidden = params[0][0].shape[1]
    out_dim = params[-1][2].shape[1]
    num_convs = 2 * len(params)

    # Lane-dense padding: all last dims (lanes) AND N (lane dim of A, contraction
    # dim of A @ H) -> multiples of 128.  bf16 sublane packing is then also full.
    f_pad = _round_up(max(fin, hidden, out_dim, 128), 128)
    n_pad = _round_up(max(n, 128), 128)
    out_pad = _round_up(max(out_dim, 128), 128)

    # Normalized adjacencies, stacked so the conv-grid index_map picks j % 2.
    a_node = build_norm_adj(edge_index, n)
    a_comm = build_norm_adj(community_edge_index, n)
    a_stack = jnp.zeros((2, n_pad, n_pad), jnp.bfloat16)
    a_stack = a_stack.at[0, :n, :n].set(a_node.astype(jnp.bfloat16))
    a_stack = a_stack.at[1, :n, :n].set(a_comm.astype(jnp.bfloat16))

    x_p = (
        jnp.zeros((n_pad, f_pad), jnp.bfloat16).at[:n, :fin].set(x.astype(jnp.bfloat16))
    )

    # Stack per-conv weights/biases.  Zero padding keeps the math exact: padded
    # input cols are zero and padded W rows/cols are zero, so padded output cols
    # stay zero (biases are zero there too), and A's padded columns are zero so
    # padded rows never leak into real rows.
    w_stack = jnp.zeros((num_convs, f_pad, f_pad), jnp.bfloat16)
    b_stack = jnp.zeros((num_convs, 1, f_pad), jnp.float32)
    for i, (nw, nb, cw, cb) in enumerate(params):
        w_stack = w_stack.at[2 * i, : nw.shape[0], : nw.shape[1]].set(
            nw.astype(jnp.bfloat16)
        )
        b_stack = b_stack.at[2 * i, 0, : nb.shape[1]].set(nb[0])
        w_stack = w_stack.at[2 * i + 1, : cw.shape[0], : cw.shape[1]].set(
            cw.astype(jnp.bfloat16)
        )
        b_stack = b_stack.at[2 * i + 1, 0, : cb.shape[1]].set(cb[0])

    # Advisory cost estimate for XLA scheduling around the custom call.
    flops = 2 * num_convs * (n_pad * f_pad * f_pad + n_pad * n_pad * f_pad)
    bytes_accessed = (
        num_convs * (n_pad * n_pad * 2 + f_pad * f_pad * 2 + f_pad * 4)
        + n_pad * f_pad * 2
        + n_pad * out_pad * 4
    )

    grid_spec = pltpu.PrefetchScalarGridSpec(
        num_scalar_prefetch=0,
        grid=(num_convs,),
        in_specs=[
            # A stack: even convs use A_node (slab 0), odd convs use A_comm (slab 1).
            pl.BlockSpec((1, n_pad, n_pad), lambda j: (j % 2, 0, 0)),
            # X: resident (constant index), only consumed at j == 0.
            pl.BlockSpec((n_pad, f_pad), lambda j: (0, 0)),
            # Per-conv weight / bias, streamed (double-buffered) over the grid.
            pl.BlockSpec((1, f_pad, f_pad), lambda j: (j, 0, 0)),
            pl.BlockSpec((1, 1, f_pad), lambda j: (j, 0, 0)),
        ],
        out_specs=pl.BlockSpec((n_pad, out_pad), lambda j: (0, 0)),
        scratch_shapes=[pltpu.VMEM((n_pad, f_pad), jnp.bfloat16)],
    )

    out_p = pl.pallas_call(
        _cfn_conv_kernel,
        out_shape=jax.ShapeDtypeStruct((n_pad, out_pad), jnp.float32),
        grid_spec=grid_spec,
        compiler_params=pltpu.CompilerParams(
            dimension_semantics=("arbitrary",),
            vmem_limit_bytes=_vmem_limit_bytes(),
        ),
        cost_estimate=pl.CostEstimate(
            flops=flops, transcendentals=0, bytes_accessed=bytes_accessed
        ),
    )(a_stack, x_p, w_stack, b_stack)

    return out_p[:n, :out_dim]


# ----------------------------------------------------------------------------
# Pure-JAX references (no Pallas) for sanity checks.
# ----------------------------------------------------------------------------
def _reference_forward_bf16(params, x, edge_index, community_edge_index):
    """Same arithmetic as the kernel (bf16 matmul inputs, f32 accumulation)."""
    n = x.shape[0]
    a_node = build_norm_adj(edge_index, n).astype(jnp.bfloat16)
    a_comm = build_norm_adj(community_edge_index, n).astype(jnp.bfloat16)
    xb = x.astype(jnp.bfloat16)
    y = None
    for nw, nb, cw, cb in params:
        h = jnp.dot(xb, nw.astype(jnp.bfloat16), preferred_element_type=jnp.float32)
        agg = jnp.dot(a_node, h.astype(jnp.bfloat16), preferred_element_type=jnp.float32)
        y = jnp.maximum(agg + nb, 0.0)
        xb = y.astype(jnp.bfloat16)
        h = jnp.dot(xb, cw.astype(jnp.bfloat16), preferred_element_type=jnp.float32)
        agg = jnp.dot(a_comm, h.astype(jnp.bfloat16), preferred_element_type=jnp.float32)
        y = jnp.maximum(agg + cb, 0.0)
        xb = y.astype(jnp.bfloat16)
    return y


def _reference_forward_f32(params, x, edge_index, community_edge_index):
    n = x.shape[0]
    a_node = build_norm_adj(edge_index, n)
    a_comm = build_norm_adj(community_edge_index, n)
    for nw, nb, cw, cb in params:
        x = jnp.maximum(a_node @ (x @ nw) + nb, 0.0)
        x = jnp.maximum(a_comm @ (x @ cw) + cb, 0.0)
    return x


if __name__ == "__main__":
    key = jax.random.PRNGKey(0)

    num_nodes = 16
    input_dim = 8
    hidden_dim = 32
    output_dim = 16
    num_layers = 2

    # Deterministic node features.
    key, kx, kp = jax.random.split(key, 3)
    x = jax.random.normal(kx, (num_nodes, input_dim), jnp.float32)

    # Deterministic node-to-node edges: a ring graph (both directions).
    src = jnp.arange(num_nodes, dtype=jnp.int32)
    dst = (src + 1) % num_nodes
    edge_index = jnp.stack(
        [jnp.concatenate([src, dst]), jnp.concatenate([dst, src])], axis=0
    )

    # Deterministic node-to-community edges: each node <-> hub of its community
    # (4 communities of 4 nodes), both directions.
    comm_hub = (jnp.arange(num_nodes, dtype=jnp.int32) // 4) * 4
    nodes = jnp.arange(num_nodes, dtype=jnp.int32)
    community_edge_index = jnp.stack(
        [jnp.concatenate([nodes, comm_hub]), jnp.concatenate([comm_hub, nodes])],
        axis=0,
    )

    params = init_cfn_params(kp, input_dim, hidden_dim, output_dim, num_layers)

    out = community_focused_network_forward(
        params, x, edge_index, community_edge_index
    )
    out = jax.block_until_ready(out)
    assert out.shape == (num_nodes, output_dim)

    # Matching-arithmetic (bf16-in / f32-acc) reference: tight tolerance.
    ref_bf16 = _reference_forward_bf16(params, x, edge_index, community_edge_index)
    assert jnp.allclose(out, ref_bf16, atol=5e-3, rtol=5e-3)

    # Full-f32 reference: loose tolerance (bf16 input rounding ~0.4% per op).
    ref_f32 = _reference_forward_f32(params, x, edge_index, community_edge_index)
    assert jnp.allclose(out, ref_f32, atol=0.1, rtol=0.1)

    print("KERNEL_OK")
</pallas_src>

<mosaic_0001>
module attributes {stable_mosaic.version = 11 : i64} {
  func.func @_cfn_conv_kernel(%arg0: i32, %arg1: memref<1x128x128xbf16, #tpu.memory_space<vmem>>, %arg2: memref<128x128xbf16, #tpu.memory_space<vmem>>, %arg3: memref<1x128x128xbf16, #tpu.memory_space<vmem>>, %arg4: memref<1x1x128xf32, #tpu.memory_space<vmem>>, %arg5: memref<128x128xf32, #tpu.memory_space<vmem>>, %arg6: memref<128x128xbf16, #tpu.memory_space<vmem>>) attributes {dimension_semantics = [#tpu.dimension_semantics<arbitrary>], iteration_bounds = array<i64: 4>, scalar_prefetch = 0 : i64, scratch_operands = 1 : i64, tpu.core_type = #tpu.core_type<tc>, window_params = [{transform_indices = @transform_0, window_bounds = array<i64: 1, 128, 128>}, {pipeline_mode = #tpu.pipeline_mode<synchronous>, transform_indices = @transform_1, window_bounds = array<i64: 128, 128>}, {transform_indices = @transform_2, window_bounds = array<i64: 1, 128, 128>}, {transform_indices = @transform_3, window_bounds = array<i64: 1, 1, 128>}, {pipeline_mode = #tpu.pipeline_mode<synchronous>, transform_indices = @transform_4, window_bounds = array<i64: 128, 128>}]} {
    %c0_i32 = arith.constant 0 : i32
    %0 = arith.cmpi eq, %arg0, %c0_i32 : i32
    %1 = arith.extui %0 : i1 to i32
    %c0_i32_0 = arith.constant 0 : i32
    %2 = arith.cmpi ne, %1, %c0_i32_0 : i32
    scf.if %2 {
      %c0_16 = arith.constant 0 : index
      %c0_17 = arith.constant 0 : index
      %23 = vector.load %arg2[%c0_16, %c0_17] : memref<128x128xbf16, #tpu.memory_space<vmem>>, vector<128x128xbf16>
      %c0_18 = arith.constant 0 : index
      %c0_19 = arith.constant 0 : index
      %24 = vector.load %arg6[%c0_18, %c0_19] : memref<128x128xbf16, #tpu.memory_space<vmem>>, vector<128x128xbf16>
      tpu.vector_store %arg6[%c0_18, %c0_19], %23 {strides = array<i32>} : memref<128x128xbf16, #tpu.memory_space<vmem>>, vector<128x128xbf16>,
    } else {
    }
    %c0 = arith.constant 0 : index
    %c0_1 = arith.constant 0 : index
    %3 = vector.load %arg6[%c0, %c0_1] : memref<128x128xbf16, #tpu.memory_space<vmem>>, vector<128x128xbf16>
    %c0_2 = arith.constant 0 : index
    %c0_3 = arith.constant 0 : index
    %c0_4 = arith.constant 0 : index
    %4 = vector.load %arg3[%c0_2, %c0_3, %c0_4] : memref<1x128x128xbf16, #tpu.memory_space<vmem>>, vector<1x128x128xbf16>
    %5 = vector.shape_cast %4 : vector<1x128x128xbf16> to vector<128x128xbf16>
    %cst = arith.constant dense<0.000000e+00> : vector<128x128xf32>
    %6 = tpu.matmul %3, %5, %cst {dimension_numbers = #tpu.dot_dimension_numbers<[1], [0], [0], [1], [0, 0, 1, 1], [], []>} : vector<128x128xbf16>, vector<128x128xbf16>, vector<128x128xf32> -> vector<128x128xf32>
    %c0_5 = arith.constant 0 : index
    %c0_6 = arith.constant 0 : index
    %c0_7 = arith.constant 0 : index
    %7 = vector.load %arg1[%c0_5, %c0_6, %c0_7] : memref<1x128x128xbf16, #tpu.memory_space<vmem>>, vector<1x128x128xbf16>
    %8 = vector.shape_cast %7 : vector<1x128x128xbf16> to vector<128x128xbf16>
    %9 = arith.truncf %6 : vector<128x128xf32> to vector<128x128xbf16>
    %cst_8 = arith.constant dense<0.000000e+00> : vector<128x128xf32>
    %10 = tpu.matmul %8, %9, %cst_8 {dimension_numbers = #tpu.dot_dimension_numbers<[1], [0], [0], [1], [0, 0, 1, 1], [], []>} : vector<128x128xbf16>, vector<128x128xbf16>, vector<128x128xf32> -> vector<128x128xf32>
    %c0_9 = arith.constant 0 : index
    %c0_10 = arith.constant 0 : index
    %c0_11 = arith.constant 0 : index
    %11 = vector.load %arg4[%c0_9, %c0_10, %c0_11] : memref<1x1x128xf32, #tpu.memory_space<vmem>>, vector<1x1x128xf32>
    %12 = vector.shape_cast %11 : vector<1x1x128xf32> to vector<1x128xf32>
    %13 = vector.broadcast %12 : vector<1x128xf32> to vector<128x128xf32>
    %14 = arith.addf %10, %13 : vector<128x128xf32>
    %cst_12 = arith.constant 0.000000e+00 : f32
    %15 = vector.broadcast %cst_12 : f32 to vector<128x128xf32>
    %16 = arith.maximumf %14, %15 : vector<128x128xf32>
    %c3_i32 = arith.constant 3 : i32
    %17 = arith.cmpi slt, %arg0, %c3_i32 : i32
    %18 = arith.extui %17 : i1 to i32
    %c0_i32_13 = arith.constant 0 : i32
    %19 = arith.cmpi ne, %18, %c0_i32_13 : i32
    scf.if %19 {
      %23 = arith.truncf %16 : vector<128x128xf32> to vector<128x128xbf16>
      %c0_16 = arith.constant 0 : index
      %c0_17 = arith.constant 0 : index
      %24 = vector.load %arg6[%c0_16, %c0_17] : memref<128x128xbf16, #tpu.memory_space<vmem>>, vector<128x128xbf16>
      tpu.vector_store %arg6[%c0_16, %c0_17], %23 {strides = array<i32>} : memref<128x128xbf16, #tpu.memory_space<vmem>>, vector<128x128xbf16>,
    } else {
    }
    %c3_i32_14 = arith.constant 3 : i32
    %20 = arith.cmpi eq, %arg0, %c3_i32_14 : i32
    %21 = arith.extui %20 : i1 to i32
    %c0_i32_15 = arith.constant 0 : i32
    %22 = arith.cmpi ne, %21, %c0_i32_15 : i32
    scf.if %22 {
      %c0_16 = arith.constant 0 : index
      %c0_17 = arith.constant 0 : index
      %23 = vector.load %arg5[%c0_16, %c0_17] : memref<128x128xf32, #tpu.memory_space<vmem>>, vector<128x128xf32>
      tpu.vector_store %arg5[%c0_16, %c0_17], %16 {strides = array<i32>} : memref<128x128xf32, #tpu.memory_space<vmem>>, vector<128x128xf32>,
    } else {
    }
    return
  }
  func.func @transform_0(%arg0: i32) -> (i32, i32, i32) {
    %c2_i32 = arith.constant 2 : i32
    %c0_i32 = arith.constant 0 : i32
    %0 = arith.cmpi eq, %c2_i32, %c0_i32 : i32
    %c1_i32 = arith.constant 1 : i32
    %1 = arith.select %0, %c1_i32, %c2_i32 : i32
    %2 = arith.remsi %arg0, %1 : i32
    %c0_i32_0 = arith.constant 0 : i32
    %3 = arith.cmpi ne, %2, %c0_i32_0 : i32
    %c0_i32_1 = arith.constant 0 : i32
    %4 = arith.cmpi slt, %2, %c0_i32_1 : i32
    %c0_i32_2 = arith.constant 0 : i32
    %5 = arith.cmpi slt, %1, %c0_i32_2 : i32
    %6 = arith.xori %4, %5 : i1
    %7 = arith.andi %6, %3 : i1
    %8 = arith.addi %2, %1 : i32
    %9 = arith.select %7, %8, %2 : i32
    %c0_i32_3 = arith.constant 0 : i32
    %c0_i32_4 = arith.constant 0 : i32
    %c0_i32_5 = arith.constant 0 : i32
    return %9, %c0_i32_3, %c0_i32_4 : i32, i32, i32
  }
  func.func @transform_1(%arg0: i32) -> (i32, i32) {
    %c0_i32 = arith.constant 0 : i32
    %c0_i32_0 = arith.constant 0 : i32
    %c0_i32_1 = arith.constant 0 : i32
    return %c0_i32, %c0_i32_0 : i32, i32
  }
  func.func @transform_2(%arg0: i32) -> (i32, i32, i32) {
    %c0_i32 = arith.constant 0 : i32
    %c0_i32_0 = arith.constant 0 : i32
    %c0_i32_1 = arith.constant 0 : i32
    return %arg0, %c0_i32, %c0_i32_0 : i32, i32, i32
  }
  func.func @transform_3(%arg0: i32) -> (i32, i32, i32) {
    %c0_i32 = arith.constant 0 : i32
    %c0_i32_0 = arith.constant 0 : i32
    %c0_i32_1 = arith.constant 0 : i32
    return %arg0, %c0_i32, %c0_i32_0 : i32, i32, i32
  }
  func.func @transform_4(%arg0: i32) -> (i32, i32) {
    %c0_i32 = arith.constant 0 : i32
    %c0_i32_0 = arith.constant 0 : i32
    %c0_i32_1 = arith.constant 0 : i32
    return %c0_i32, %c0_i32_0 : i32, i32
  }
}

</mosaic_0001>

<bundles_post_ra>
// kernel: tpu_custom_call.1
= control target key start
LH: loop header
LB: loop body
LE: loop exit
PB: predicated region body
PF: predicated region fallthrough
CT: control target
= control target key end

     0   :  { %s1703_s0 = inlined_call_operand.hbm [shape: bf16[2,128,128], index: 0, kind: input, shape index: {}]   ;;  %s1704_s1 = inlined_call_operand.hbm [shape: bf16[128,128], index: 1, kind: input, shape index: {}]   ;;  %s1705_s2 = inlined_call_operand.hbm [shape: bf16[4,128,128], index: 2, kind: input, shape index: {}]   ;;  %s1706_s3 = inlined_call_operand.hbm [shape: f32[4,1,128], index: 3, kind: input, shape index: {}]   ;;  %s1707_s4 = inlined_call_operand.hbm [shape: f32[128,128], index: 4, kind: output, shape index: {}]  }
   0x1   :  { %1710 = sst [smem:[#allocation15_spill]] %s1703_s0 }
   0x2   :  { %9 = vsyncpa [#allocation4], 0 }
   0x3   :  { %11 = vsyncpa [#allocation4 + $0x1], 0 }
   0x4   :  { %12 = vsyncpa [#allocation7], 0 }
   0x5   :  { %13 = vsyncpa [#allocation5], 0  ;;  %s1421_s15 = smov 0   ;;  %s1423_s16 = smov 0  }
   0x6   :  { %s1425_s17 = smov 0   ;;  %s1427_s18 = smov 0  }
   0x7   :  { %s1429_s19 = smov 0   ;;  %s1431_s20 = smov 0  }
   0x8   :  { %s1433_s21 = smov 0  }
   0x9 LB: > { %s1457_s22 = sadd.s32 1, %s1388_s21   ;;  %p23_p0 = scmp.lt.s32.totalorder %s1388_s21, 0  ;;  %s1388_s21 = sphi %s1433_s21, %s1726_s21   ;;  %s1384_s20 = sphi %s1431_s20, %s1725_s20   ;;  %s1380_s19 = sphi %s1429_s19, %s1724_s19   ;;  %s1376_s18 = sphi %s1427_s18, %s1723_s18   ;;  %s1372_s17 = sphi %s1425_s17, %s1722_s17   ;;  %s1368_s16 = sphi %s1423_s16, %s1721_s16   ;;  %s1364_s15 = sphi %s1421_s15, %s1720_s15  }
   0xa   : > { %s24_s23 = ssub.s32 0, %s1388_s21  ;;  %p35_p1 = scmp.lt.s32.totalorder %s1457_s22, 0 }
   0xb   : > { %s860_s24 = smin.u32 %s1388_s21, %s24_s23  ;;  %s36_s25 = ssub.s32 0, %s1457_s22 }
   0xc   : > { %s26_s26 = sand.u32 1, %s860_s24   ;;  %s863_s27 = smin.u32 %s36_s25, %s1457_s22 }
   0xd   : > { %s27_s28 = ssub.s32 0, %s26_s26  ;;  %s38_s29 = sand.u32 1, %s863_s27  }
   0xe   : > { %s1728_s28 = smov (!%p23_p0, %s27_s28), %s26_s26  ;;  %s39_s30 = ssub.s32 0, %s38_s29 }
   0xf   : > { %s50_s5 = sadd.s32 1, %s1384_s20  ;;  %p862_p2 = scmp.lt.s32.totalorder %s1728_s28, 0 }
  0x10   : > { %s33_s6 = sadd.s32 2, %s1728_s28  ;;  %s1730_s30 = smov (!%p35_p1, %s39_s30), %s38_s29 }
  0x11   : > { %s1732_s6 = smov (!%p862_p2, %s33_s6), %s1728_s28  ;;  %p865_p3 = scmp.lt.s32.totalorder %s1730_s30, 0 }
  0x12   : > { %s45_s7 = sadd.s32 2, %s1730_s30  ;;  %p57_p4 = scmp.ne.s32.totalorder %s1384_s20, %s1380_s19 }
  0x13   : > { %p58_p5 = scmp.eq.s32.totalorder %s1388_s21, 0  ;;  %s1734_s7 = smov (!%p865_p3, %s45_s7), %s1730_s30 }
  0x14   : > { %p63_p7 = scmp.ne.s32.totalorder %s1380_s19, %s1376_s18  ;;  %s47_s9 = ssub.s32 %s1732_s6, %s1734_s7 }
  0x15   : > { %p1471_p6 = por %p58_p5, %p57_p4  ;;  %p48_p8 = scmp.eq.s32.totalorder %s47_s9, 0 }
  0x16   : > { %p1103_p9 = scmp.lt.s32.totalorder %s1388_s21, 4  ;;  %s195_s11 = sand.u32 1, %s1388_s21  }
  0x17   : > { %s1479_s10 = scalar_select %p48_p8, %s1384_s20, %s50_s5  }
  0x18   : > { %s197_s12 = sand.u32 1, %s1384_s20   ;;  %s985_s14 = sshll.u32 %s1732_s6, 6 }
  0x19   : > { %s869_s13 = sshll.u32 %s197_s12, 6  ;;  %s1712_s0 = sld [smem:[#allocation15_spill]] }
  0x1a   : > { %s199_s26 = scalar_lea.vmem [#allocation3], %s869_s13  ;;  %p1490_p10 = pnand %p1103_p9, %p1471_p6 }
  0x1b   : > { %s219_s27 = sshll.u32 %s199_s26, 4  ;;  %s1494_s30 = scalar_lea.sflag [#allocation4], %s195_s11  ;;  %s220_s27 = int_to_ptr.vmem [resolvable:$true] %s219_s27 }
  0x1c   : > { %p1174_p12 = pneg %p1490_p10 }
  0x1f   : > { %s216_s25 = scalar_lea.hbm %s1712_s0, %s985_s14  ;;  %s1177_s8 = scalar_lea.hbm %s1712_s0, 128 }
  0x20   : > { %s217_s28 = sshll.u32 %s216_s25, 4  ;;  %s218_s28 = int_to_ptr.hbm [resolvable:$true] %s217_s28 }
  0x21   : > { %s1170_s5 = sshra.s32 %s218_s28, 4  ;;  %s1171_s5 = int_to_ptr.hbm [resolvable:$true] %s1170_s5 }
  0x22   : > { %s1172_s6 = scalar_lea.hbm %s1171_s5, 64  ;;  %p1178_p1 = scmp.lt.s32.totalorder %s1171_s5, %s1712_s0 }
  0x23   : > { %p1173_p11 = scmp.ne.s32.totalorder %s1171_s5, %s1172_s6  ;;  %p1179_p2 = scmp.lt.s32.totalorder %s1177_s8, %s1172_s6 }
  0x25   : > { %p1175_p13 = pnand %p1174_p12, %p1173_p11  ;;  %p1180_p3 = por %p1179_p2, %p1178_p1 }
  0x27   : > { %p1176_p0 = pneg %p1175_p13 }
  0x29   : > { %p1181_p4 = pnand %p1180_p3, %p1176_p0 }
  0x2b   : > { %1184 = shalt.err (!%p1181_p4)
}
  0x2c   : > { %s1708_s11 = smov 64   ;;  %s1709_s14 = smov 4  }
  0x2d   : > { %1095 = dma.hbm_to_vmem [thread:$0]  (!%p1490_p10), %s218_s28, 1024, %s220_s27, %s1494_s30, %s1708_s11, %s1708_s11, %s1709_s14  }
  0x2e   : > { %s94_s23 = ssub.s32 %s1388_s21, %s1457_s22  ;;  %s97_s24 = sadd.s32 1, %s1372_s17 }
  0x2f   : > { %p95_p6 = scmp.eq.s32.totalorder %s94_s23, 0  ;;  %p104_p8 = scmp.ne.s32.totalorder %s1372_s17, %s1368_s16 }
  0x30   : > { %s231_s25 = sand.u32 1, %s1372_s17   ;;  %s986_s6 = sshll.u32 %s1388_s21, 6 }
  0x31   : > { %s1517_s26 = scalar_select %p95_p6, %s1372_s17, %s97_s24  }
  0x32   : > { %p106_p11 = por %p104_p8, %p58_p5  ;;  %s875_s5 = sshll.u32 %s231_s25, 6 }
  0x33   : > { %s238_s9 = scalar_lea.hbm %s1705_s2, %s986_s6  ;;  %s233_s8 = scalar_lea.vmem [#allocation8], %s875_s5 }
  0x34   : > { %s241_s27 = sshll.u32 %s233_s8, 4  ;;  %s239_s28 = sshll.u32 %s238_s9, 4  ;;  %s242_s27 = int_to_ptr.vmem [resolvable:$true] %s241_s27  ;;  %s240_s28 = int_to_ptr.hbm [resolvable:$true] %s239_s28 }
  0x35   : > { %p1529_p10 = pnand %p1103_p9, %p106_p11  ;;  %s1534_s13 = sadd.s32 4294967295, %s1388_s21  }
  0x36   : > { %s1200_s23 = sshra.s32 %s240_s28, 4  ;;  %s1207_s7 = scalar_lea.hbm %s1705_s2, 256  ;;  %s1201_s23 = int_to_ptr.hbm [resolvable:$true] %s1200_s23 }
  0x37   : > { %s1202_s24 = scalar_lea.hbm %s1201_s23, 64  ;;  %p1204_p12 = pneg %p1529_p10 }
  0x38   : > { %p1203_p5 = scmp.ne.s32.totalorder %s1201_s23, %s1202_s24  ;;  %p1208_p9 = scmp.lt.s32.totalorder %s1201_s23, %s1705_s2 }
  0x39   : > { %p1209_p1 = scmp.lt.s32.totalorder %s1207_s7, %s1202_s24 }
  0x3a   : > { %p1205_p13 = pnand %p1204_p12, %p1203_p5 }
  0x3b   : > { %p1210_p2 = por %p1209_p1, %p1208_p9 }
  0x3c   : > { %p1206_p0 = pneg %p1205_p13 }
  0x3e   : > { %p1211_p3 = pnand %p1210_p2, %p1206_p0 }
  0x40   : > { %1214 = shalt.err (!%p1211_p3)
}
  0x41   : > { %1098 = dma.hbm_to_vmem [thread:$0]  (!%p1529_p10), %s240_s28, 1024, %s242_s27, %s1494_s30, %s1708_s11, %s1708_s11, %s1709_s14  }
  0x42   : > { %p64_p4 = scmp.eq.s32.totalorder %s1534_s13, 0  ;;  %p110_p6 = scmp.ne.s32.totalorder %s1368_s16, %s1364_s15 }
  0x43   : > { %p866_p8 = scmp.ge.s32.totalorder %s1388_s21, 1  ;;  %p168_p11 = scmp.lt.s32.totalorder %s1388_s21, 5 }
  0x44   : > { %p1563_p5 = por %p64_p4, %p63_p7  ;;  %p1569_p13 = por %p110_p6, %p64_p4 }
  0x45   : > { %p1573_p0 = pnand %p866_p8, %p168_p11  ;;  %p867_p9 = scmp.ne.s32.totalorder %s1534_s13, 0 }
  0x46   : > { %s179_s18 = sshll.u32 %s1704_s1, 4  ;;  %s1392_s28 = smov [#allocation6]   ;;  %s180_s18 = int_to_ptr.hbm [resolvable:$true] %s179_s18 }
  0x47   : > { %p1088_p7 = pneg %p1573_p0  ;;  %s181_s5 = sshll.u32 %s1392_s28, 4  ;;  %s182_s5 = int_to_ptr.vmem [resolvable:$true] %s181_s5 }
  0x48   : > { %s257_s29 = scalar_lea.hbm %s1706_s3, %s1388_s21  ;;  %s254_s9 = scalar_lea.vmem [#allocation9], %s231_s25 }
  0x49   : > { %p1089_p1 = pnand %p1088_p7, %p64_p4  ;;  %s261_s11 = sshll.u32 %s254_s9, 4  ;;  %s262_s11 = int_to_ptr.vmem [resolvable:$true] %s261_s11 }
  0x4a   : > { %s259_s14 = sshll.u32 %s257_s29, 4  ;;  %s1718_s0 = smov 4   ;;  %s260_s14 = int_to_ptr.hbm [resolvable:$true] %s259_s14 }
  0x4b   : > { %s1719_s15 = smov 64   ;;  %s1260_s27 = sshra.s32 %s260_s14, 4  ;;  %s1261_s27 = int_to_ptr.hbm [resolvable:$true] %s1260_s27 }
  0x4c   : > { %1091 = dma.hbm_to_vmem [thread:$0]  (!%p1089_p1), %s180_s18, 1024, %s182_s5, [#allocation7], %s1719_s15, %s1719_s15, %s1718_s0  }
  0x4d   : > { %s1262_s28 = scalar_lea.hbm %s1261_s27, 1  ;;  %s1267_s25 = scalar_lea.hbm %s1706_s3, 4 }
  0x4e   : > { %p1263_p2 = scmp.ne.s32.totalorder %s1261_s27, %s1262_s28  ;;  %p1268_p8 = scmp.lt.s32.totalorder %s1261_s27, %s1706_s3 }
  0x4f   : > { %p1269_p11 = scmp.lt.s32.totalorder %s1267_s25, %s1262_s28 }
  0x50   : > { %p1265_p3 = pnand %p1263_p2, %p1204_p12 }
  0x51   : > { %p1270_p7 = por %p1269_p11, %p1268_p8 }
  0x52   : > { %p1266_p6 = pneg %p1265_p3 }
  0x54   : > { %p1271_p1 = pnand %p1270_p7, %p1266_p6 }
  0x56   : > { %1274 = shalt.err (!%p1271_p1)
}
  0x57   : > { %1101 = dma.hbm_to_vmem [thread:$0]  (!%p1529_p10), %s260_s14, 16, %s262_s11, %s1494_s30  }
  0x58   : > { %270 = sbr.rel (%p1573_p0) target bundleno = 597 (0x255), region = 36  ;;  %s272_s0 = sand.u32 (!%p1573_p0), 1, %s1534_s13  }
  0x59   : > { %s274_s18 = sand.u32 (!%p1573_p0), 1, %s1380_s19   ;;  %s273_s9 = scalar_lea.sflag (!%p1573_p0), [#allocation4], %s272_s0 }
  0x5a   : > { %s879_s5 = sshll.u32 (!%p1573_p0), %s274_s18, 6 }
  0x5b   : > { %s1610_s15 = scalar_lea.vmem (!%p1573_p0), [#allocation3], %s879_s5 }
  0x5d   : > { %1347 = dma.done.wait (%p1563_p5), %s273_s9, 1024  }
  0x5e   : > { %1349 = vsyncadd (%p1563_p5), %s273_s9, 4294966272 }
  0x5f   : > { %1351 = dma.done.wait (%p64_p4), [#allocation7], 1024  }
  0x60   : > { %1353 = vsyncadd (%p64_p4), [#allocation7], 4294966272  ;;  %s289_s30 = sand.u32 1, %s1368_s16  }
  0x61   : > { %s881_s11 = sshll.u32 %s289_s30, 6 }
  0x62   : > { %s1621_s14 = scalar_lea.vmem [#allocation8], %s881_s11 }
  0x63   : > { %1355 = dma.done.wait (%p1569_p13), %s273_s9, 1040  }
  0x64   : > { %1357 = vsyncadd (%p1569_p13), %s273_s9, 4294966256  ;;  %s1627_s12 = scalar_lea.vmem [#allocation9], %s289_s30  ;;  %345 = sbr.rel (%p867_p9) target bundleno = 114 (0x72), region = 56 }
  0x69   : > { %v346_v0 = vld [vmem:[#allocation6] sm:$0xff]   ;;  %v348_v1 = vld [vmem:[#allocation6 + $0x8] sm:$0xff]   ;;  %v350_v2 = vld [vmem:[#allocation6 + $0x10] sm:$0xff]  }
  0x6a   : > { %362 = vst [vmem:[#allocation2] sm:$0xff] %v346_v0   ;;  %v352_v3 = vld [vmem:[#allocation6 + $0x18] sm:$0xff]   ;;  %v354_v4 = vld [vmem:[#allocation6 + $0x20] sm:$0xff]   ;;  %v356_v5 = vld [vmem:[#allocation6 + $0x28] sm:$0xff]  }
  0x6b   : > { %364 = vst [vmem:[#allocation2 + $0x8] sm:$0xff] %v348_v1   ;;  %v358_v6 = vld [vmem:[#allocation6 + $0x30] sm:$0xff]   ;;  %v360_v7 = vld [vmem:[#allocation6 + $0x38] sm:$0xff]  }
  0x6c   : > { %366 = vst [vmem:[#allocation2 + $0x10] sm:$0xff] %v350_v2  }
  0x6d   : > { %368 = vst [vmem:[#allocation2 + $0x18] sm:$0xff] %v352_v3  }
  0x6e   : > { %370 = vst [vmem:[#allocation2 + $0x20] sm:$0xff] %v354_v4  }
  0x6f   : > { %372 = vst [vmem:[#allocation2 + $0x28] sm:$0xff] %v356_v5  }
  0x70   : > { %374 = vst [vmem:[#allocation2 + $0x30] sm:$0xff] %v358_v6  }
  0x71   : > { %376 = vst [vmem:[#allocation2 + $0x38] sm:$0xff] %v360_v7  }
  0x72 PF: > { %v1002_v8 = vld [vmem:[%s1621_s14 + $0x38] sm:$0xff]  ;;  %v1001_v9 = vld [vmem:[%s1621_s14 + $0x30] sm:$0xff]  ;;  %v1000_v10 = vld [vmem:[%s1621_s14 + $0x28] sm:$0xff]  ;;  %p979_p10 = scmp.ge.s32.totalorder %s1534_s13, 3 }
  0x73   : > { %1058 = vmatpush.bf16.msra.mxu2 %v1002_v8  ;;  %506 = vmatpush.bf16.msra.mxu0 %v1002_v8  ;;  %v999_v11 = vld [vmem:[%s1621_s14 + $0x20] sm:$0xff]  ;;  %v998_v12 = vld [vmem:[%s1621_s14 + $0x18] sm:$0xff]  ;;  %v997_v13 = vld [vmem:[%s1621_s14 + $0x10] sm:$0xff] }
  0x74   : > { %v996_v14 = vld [vmem:[%s1621_s14 + $0x8] sm:$0xff]  ;;  %v995_v15 = vld [vmem:[%s1621_s14] sm:$0xff]  ;;  %v989_v21 = vld [vmem:[#allocation2 + $0x10] sm:$0xff] }
  0x75   : > { %v991_v16 = vld [vmem:[#allocation2 + $0x20] sm:$0xff]  ;;  %v988_v19 = vld [vmem:[#allocation2 + $0x8] sm:$0xff]  ;;  %v990_v23 = vld [vmem:[#allocation2 + $0x18] sm:$0xff] }
  0x76   : > { %v987_v17 = vld [vmem:[#allocation2] sm:$0xff]  ;;  %v992_v18 = vld [vmem:[#allocation2 + $0x28] sm:$0xff]  ;;  %v1005_v52 = vld [vmem:[%s1610_s15 + $0x10] sm:$0xff] }
  0x77   : > { %1059 = vmatpush.bf16.msra.mxu2 %v1001_v9  ;;  %507 = vmatpush.bf16.msra.mxu0 %v1001_v9  ;;  %v993_v20 = vld [vmem:[#allocation2 + $0x30] sm:$0xff]  ;;  %v1003_v48 = vld [vmem:[%s1610_s15] sm:$0xff]  ;;  %v1004_v50 = vld [vmem:[%s1610_s15 + $0x8] sm:$0xff] }
  0x78   : > { %v994_v22 = vld [vmem:[#allocation2 + $0x38] sm:$0xff]  ;;  %v1007_v49 = vld [vmem:[%s1610_s15 + $0x20] sm:$0xff]  ;;  %v1008_v51 = vld [vmem:[%s1610_s15 + $0x28] sm:$0xff] }
  0x79   : > { %v1009_v53 = vld [vmem:[%s1610_s15 + $0x30] sm:$0xff]  ;;  %v1006_v54 = vld [vmem:[%s1610_s15 + $0x18] sm:$0xff]  ;;  %v1169_v56 = vld [vmem:[%s1627_s12] ss:$0 sm:$0xff] }
  0x7a   : > { %v1010_v55 = vld [vmem:[%s1610_s15 + $0x38] sm:$0xff] }
  0x7b   : > { %1060 = vmatpush.bf16.msra.mxu2 %v1000_v10  ;;  %508 = vmatpush.bf16.msra.mxu0 %v1000_v10 }
  0x7f   : > { %1061 = vmatpush.bf16.msra.mxu2 %v999_v11  ;;  %509 = vmatpush.bf16.msra.mxu0 %v999_v11 }
  0x83   : > { %1062 = vmatpush.bf16.msra.mxu2 %v998_v12  ;;  %510 = vmatpush.bf16.msra.mxu0 %v998_v12 }
  0x87   : > { %1063 = vmatpush.bf16.msra.mxu2 %v997_v13  ;;  %511 = vmatpush.bf16.msra.mxu0 %v997_v13 }
  0x8b   : > { %1064 = vmatpush.bf16.msra.mxu2 %v996_v14  ;;  %512 = vmatpush.bf16.msra.mxu0 %v996_v14 }
  0x8f   : > { %1065 = vmatpush.bf16.msra.mxu2 %v995_v15  ;;  %513 = vmatpush.bf16.msra.mxu0 %v995_v15 }
  0x92   : > { %534 = vmatmul.bf16.vlgmr.msra.gmra.mxu2 %v991_v16  ;;  %514 = vmatmul.bf16.vlgmr.msra.gmra.mxu0 %v987_v17 }
  0xa2   : > { %539 = vmatmul.bf16.gmra.mxu2 %v992_v18  ;;  %519 = vmatmul.bf16.gmra.mxu0 %v988_v19 }
  0xb2   : > { %544 = vmatmul.bf16.gmra.mxu2 %v993_v20  ;;  %524 = vmatmul.bf16.gmra.mxu0 %v989_v21 }
  0xc2   : > { %549 = vmatmul.bf16.gmra.mxu2 %v994_v22  ;;  %529 = vmatmul.bf16.gmra.mxu0 %v990_v23 }
 0x10f   : > { %v515_v25 = vpop.f32.mrf.mxu0 }
 0x115   : > { %v535_v24 = vpop.f32.mrf.mxu2 }
 0x117   : > { %v517_v27 = vpop.f32.mrf.mxu0 }
 0x118   : > { %v571_v47 = vpack.c.bf16 %v517_v27, %v515_v25 }
 0x11d   : > { %v537_v26 = vpop.f32.mrf.mxu2 }
 0x11e   : > { %v575_v42 = vpack.c.bf16 %v537_v26, %v535_v24 }
 0x11f   : > { %v520_v29 = vpop.f32.mrf.mxu0 }
 0x125   : > { %v540_v28 = vpop.f32.mrf.mxu2 }
 0x127   : > { %v522_v31 = vpop.f32.mrf.mxu0 }
 0x128   : > { %v572_v46 = vpack.c.bf16 %v522_v31, %v520_v29 }
 0x12d   : > { %v542_v30 = vpop.f32.mrf.mxu2 }
 0x12e   : > { %v576_v41 = vpack.c.bf16 %v542_v30, %v540_v28 }
 0x12f   : > { %v525_v33 = vpop.f32.mrf.mxu0 }
 0x135   : > { %v545_v32 = vpop.f32.mrf.mxu2 }
 0x137   : > { %v527_v36 = vpop.f32.mrf.mxu0 }
 0x138   : > { %v573_v45 = vpack.c.bf16 %v527_v36, %v525_v33 }
 0x13d   : > { %v547_v34 = vpop.f32.mrf.mxu2 }
 0x13e   : > { %v577_v40 = vpack.c.bf16 %v547_v34, %v545_v32 }
 0x13f   : > { %v530_v39 = vpop.f32.mrf.mxu0 }
 0x145   : > { %v550_v35 = vpop.f32.mrf.mxu2 }
 0x147   : > { %v532_v43 = vpop.f32.mrf.mxu0 }
 0x148   : > { %v574_v44 = vpack.c.bf16 %v532_v43, %v530_v39 }
 0x14d   : > { %v552_v37 = vpop.f32.mrf.mxu2 }
 0x14e   : > { %v578_v38 = vpack.c.bf16 %v552_v37, %v550_v35 }
 0x150   : > { %631 = vmatpush.bf16.msra.mxu1 %v578_v38  ;;  %1066 = vmatpush.bf16.msra.mxu3 %v578_v38 }
 0x154   : > { %632 = vmatpush.bf16.msra.mxu1 %v577_v40  ;;  %1067 = vmatpush.bf16.msra.mxu3 %v577_v40 }
 0x158   : > { %633 = vmatpush.bf16.msra.mxu1 %v576_v41  ;;  %1068 = vmatpush.bf16.msra.mxu3 %v576_v41 }
 0x15c   : > { %634 = vmatpush.bf16.msra.mxu1 %v575_v42  ;;  %1069 = vmatpush.bf16.msra.mxu3 %v575_v42 }
 0x160   : > { %635 = vmatpush.bf16.msra.mxu1 %v574_v44  ;;  %1070 = vmatpush.bf16.msra.mxu3 %v574_v44 }
 0x164   : > { %636 = vmatpush.bf16.msra.mxu1 %v573_v45  ;;  %1071 = vmatpush.bf16.msra.mxu3 %v573_v45 }
 0x168   : > { %637 = vmatpush.bf16.msra.mxu1 %v572_v46  ;;  %1072 = vmatpush.bf16.msra.mxu3 %v572_v46 }
 0x16c   : > { %638 = vmatpush.bf16.msra.mxu1 %v571_v47  ;;  %1073 = vmatpush.bf16.msra.mxu3 %v571_v47 }
 0x16f   : > { %639 = vmatmul.bf16.vlgmr.msra.gmra.mxu1 %v1003_v48  ;;  %659 = vmatmul.bf16.vlgmr.msra.gmra.mxu3 %v1007_v49 }
 0x17f   : > { %644 = vmatmul.bf16.gmra.mxu1 %v1004_v50  ;;  %664 = vmatmul.bf16.gmra.mxu3 %v1008_v51 }
 0x18f   : > { %649 = vmatmul.bf16.gmra.mxu1 %v1005_v52  ;;  %669 = vmatmul.bf16.gmra.mxu3 %v1009_v53 }
 0x19f   : > { %654 = vmatmul.bf16.gmra.mxu1 %v1006_v54  ;;  %674 = vmatmul.bf16.gmra.mxu3 %v1010_v55 }
 0x1ec   : > { %v640_v57 = vpop.f32.mrf.mxu1 }
 0x1ed   : > { %v1648_v58 = vadd.f32 %v1169_v56, %v640_v57 }
 0x1ef   : > { %v680_v59 = vmax.f32 %v1648_v58, 0.0 }
 0x1f2   : > { %v660_v60 = vpop.f32.mrf.mxu3 }
 0x1f3   : > { %v1651_v61 = vadd.f32 %v1169_v56, %v660_v60 }
 0x1f4   : > { %v642_v62 = vpop.f32.mrf.mxu1 }
 0x1f5   : > { %v688_v63 = vmax.f32 %v1651_v61, 0.0  ;;  %v1654_v0 = vadd.f32 %v1169_v56, %v642_v62 }
 0x1f7   : > { %v681_v1 = vmax.f32 %v1654_v0, 0.0 }
 0x1fa   : > { %v662_v2 = vpop.f32.mrf.mxu3 }
 0x1fb   : > { %v1657_v3 = vadd.f32 %v1169_v56, %v662_v2 }
 0x1fc   : > { %v645_v4 = vpop.f32.mrf.mxu1 }
 0x1fd   : > { %v689_v5 = vmax.f32 %v1657_v3, 0.0  ;;  %v646_v6 = vadd.f32 %v1169_v56, %v645_v4 }
 0x1ff   : > { %v682_v7 = vmax.f32 %v646_v6, 0.0 }
 0x202   : > { %v665_v8 = vpop.f32.mrf.mxu3 }
 0x203   : > { %v1660_v9 = vadd.f32 %v1169_v56, %v665_v8 }
 0x204   : > { %v647_v10 = vpop.f32.mrf.mxu1 }
 0x205   : > { %v690_v11 = vmax.f32 %v1660_v9, 0.0  ;;  %v648_v12 = vadd.f32 %v1169_v56, %v647_v10 }
 0x207   : > { %v683_v13 = vmax.f32 %v648_v12, 0.0 }
 0x20a   : > { %v667_v14 = vpop.f32.mrf.mxu3 }
 0x20b   : > { %v668_v15 = vadd.f32 %v1169_v56, %v667_v14 }
 0x20c   : > { %v650_v16 = vpop.f32.mrf.mxu1 }
 0x20d   : > { %v691_v17 = vmax.f32 %v668_v15, 0.0  ;;  %v651_v18 = vadd.f32 %v1169_v56, %v650_v16 }
 0x20f   : > { %v684_v19 = vmax.f32 %v651_v18, 0.0 }
 0x212   : > { %v670_v20 = vpop.f32.mrf.mxu3 }
 0x213   : > { %v671_v21 = vadd.f32 %v1169_v56, %v670_v20 }
 0x214   : > { %v652_v22 = vpop.f32.mrf.mxu1 }
 0x215   : > { %v692_v23 = vmax.f32 %v671_v21, 0.0  ;;  %v653_v24 = vadd.f32 %v1169_v56, %v652_v22 }
 0x217   : > { %v685_v25 = vmax.f32 %v653_v24, 0.0 }
 0x21a   : > { %v672_v26 = vpop.f32.mrf.mxu3 }
 0x21b   : > { %v673_v27 = vadd.f32 %v1169_v56, %v672_v26 }
 0x21c   : > { %v655_v28 = vpop.f32.mrf.mxu1 }
 0x21d   : > { %v693_v29 = vmax.f32 %v673_v27, 0.0  ;;  %v656_v30 = vadd.f32 %v1169_v56, %v655_v28 }
 0x21f   : > { %v686_v31 = vmax.f32 %v656_v30, 0.0 }
 0x222   : > { %v675_v32 = vpop.f32.mrf.mxu3 }
 0x223   : > { %v676_v33 = vadd.f32 %v1169_v56, %v675_v32 }
 0x224   : > { %v657_v34 = vpop.f32.mrf.mxu1 }
 0x225   : > { %v694_v35 = vmax.f32 %v676_v33, 0.0  ;;  %v658_v36 = vadd.f32 %v1169_v56, %v657_v34 }
 0x227   : > { %v687_v37 = vmax.f32 %v658_v36, 0.0 }
 0x229   : > { %699 = sbr.rel (%p979_p10) target bundleno = 568 (0x238), region = 60 }
 0x22a   : > { %v677_v38 = vpop.f32.mrf.mxu3 }
 0x22b   : > { %v678_v39 = vadd.f32 %v1169_v56, %v677_v38 }
 0x22d   : > { %v695_v40 = vmax.f32 %v678_v39, 0.0 }
 0x22e   : > { %v1014_v41 = vpack.c.bf16 %v681_v1, %v680_v59  ;;  %v1019_v42 = vpack.c.bf16 %v683_v13, %v682_v7  ;;  %v1024_v43 = vpack.c.bf16 %v685_v25, %v684_v19  ;;  %v1029_v44 = vpack.c.bf16 %v687_v37, %v686_v31 }
 0x22f   : > { %v1034_v45 = vpack.c.bf16 %v689_v5, %v688_v63  ;;  %v1039_v46 = vpack.c.bf16 %v691_v17, %v690_v11  ;;  %v1044_v47 = vpack.c.bf16 %v693_v29, %v692_v23  ;;  %v1049_v48 = vpack.c.bf16 %v695_v40, %v694_v35 }
 0x230   : > { %1015 = vst [vmem:[#allocation2] sm:$0xff] %v1014_v41  }
 0x231   : > { %1051 = vst [vmem:[#allocation2 + $0x8] sm:$0xff] %v1019_v42  }
 0x232   : > { %1052 = vst [vmem:[#allocation2 + $0x10] sm:$0xff] %v1024_v43  }
 0x233   : > { %1053 = vst [vmem:[#allocation2 + $0x18] sm:$0xff] %v1029_v44  }
 0x234   : > { %1054 = vst [vmem:[#allocation2 + $0x20] sm:$0xff] %v1034_v45  }
 0x235   : > { %1055 = vst [vmem:[#allocation2 + $0x28] sm:$0xff] %v1039_v46  }
 0x236   : > { %1056 = vst [vmem:[#allocation2 + $0x30] sm:$0xff] %v1044_v47  }
 0x237   : > { %1057 = vst [vmem:[#allocation2 + $0x38] sm:$0xff] %v1049_v48  }
 0x238 PF: > { %p980_p12 = scmp.ne.s32.totalorder %s1534_s13, 3 }
 0x23a   : > { %735 = sbr.rel (%p980_p12) target bundleno = 591 (0x24f), region = 64 }
 0x23f   : > { %736 = vst [vmem:[#allocation10] sm:$0xff] %v680_v59 }
 0x240   : > { %737 = vst [vmem:[#allocation10 + $0x8] sm:$0xff] %v681_v1 }
 0x241   : > { %738 = vst [vmem:[#allocation10 + $0x10] sm:$0xff] %v682_v7 }
 0x242   : > { %739 = vst [vmem:[#allocation10 + $0x18] sm:$0xff] %v683_v13 }
 0x243   : > { %740 = vst [vmem:[#allocation10 + $0x20] sm:$0xff] %v684_v19 }
 0x244   : > { %741 = vst [vmem:[#allocation10 + $0x28] sm:$0xff] %v685_v25 }
 0x245   : > { %742 = vst [vmem:[#allocation10 + $0x30] sm:$0xff] %v686_v31 }
 0x246   : > { %743 = vst [vmem:[#allocation10 + $0x38] sm:$0xff] %v687_v37 }
 0x247   : > { %744 = vst [vmem:[#allocation10 + $0x40] sm:$0xff] %v688_v63 }
 0x248   : > { %745 = vst [vmem:[#allocation10 + $0x48] sm:$0xff] %v689_v5 }
 0x249   : > { %746 = vst [vmem:[#allocation10 + $0x50] sm:$0xff] %v690_v11 }
 0x24a   : > { %747 = vst [vmem:[#allocation10 + $0x58] sm:$0xff] %v691_v17 }
 0x24b   : > { %748 = vst [vmem:[#allocation10 + $0x60] sm:$0xff] %v692_v23 }
 0x24c   : > { %749 = vst [vmem:[#allocation10 + $0x68] sm:$0xff] %v693_v29 }
 0x24d   : > { %750 = vst [vmem:[#allocation10 + $0x70] sm:$0xff] %v694_v35 }
 0x24e   : > { %751 = vst [vmem:[#allocation10 + $0x78] sm:$0xff] %v695_v40 }
 0x24f PF: > { %p1105_p4 = scmp.eq.s32.totalorder %s1534_s13, 3  ;;  %s1393_s8 = smov [#allocation10]  }
 0x250   : > { %s757_s23 = sshll.u32 %s1393_s8, 4  ;;  %s759_s28 = sshll.u32 %s1707_s4, 4  ;;  %s758_s23 = int_to_ptr.vmem [resolvable:$true] %s757_s23  ;;  %s760_s28 = int_to_ptr.hbm [resolvable:$true] %s759_s28 }
 0x251   : > { %s1394_s6 = smov 128   ;;  %s1395_s21 = smov 8  }
 0x252   : > { %1085 = dma.vmem_to_hbm [thread:$0]  (%p1105_p4), %s758_s23, 2048, %s760_s28, [#allocation5], %s1394_s6, %s1394_s6, %s1395_s21  }
 0x253   : > { %1359 = dma.done.wait (%p1105_p4), [#allocation5], 2048  }
 0x254   : > { %1361 = vsyncadd (%p1105_p4), [#allocation5], 4294965248 }
 0x255 PF: > { %p16_p5 = scmp.ge.s32.totalorder %s1457_s22, 6   ;;  %s1720_s15 = smov %s1368_s16 }
 0x256   : > { %s1721_s16 = smov %s1372_s17  ;;  %s1722_s17 = smov %s1517_s26 }
 0x257   : > { %s1723_s18 = smov %s1380_s19  ;;  %s1724_s19 = smov %s1384_s20 }
 0x258   : > { %s1725_s20 = smov %s1479_s10  ;;  %s1726_s21 = smov %s1457_s22 }
 0x259   :  { %18 = sbr.rel (!%p16_p5) target bundleno = 9 (0x9), region = 111 }
 0x25e   :  { %776 = vsyncpa [#allocation4], 1 }
 0x25f   :  { %778 = vsyncpa [#allocation4 + $0x1], 1 }
 0x260   :  { %779 = vsyncpa [#allocation7], 1 }
 0x261   :  { %780 = vsyncpa [#allocation5], 1 }
 0x262   :  { %782 = vsyncpa [#allocation5 + $0x1], 1 }

</bundles_post_ra>
